<compile_context>
chip_gen: v7x
topology: tpu7x:2x2x1
jax: 0.10.0
libtpu: 0.0.40
codegen_flags: <defaults>
</compile_context>

<pallas_src>
import functools

import jax
import jax.numpy as jnp
from jax import lax
from jax.experimental import pallas as pl
from jax.experimental.pallas import tpu as pltpu


def _pnorm_rows(v, p):
    """p-norm along the last (component) axis, keepdims -> (rows, 1)."""
    if p == 2:
        return jnp.sqrt(jnp.sum(v * v, axis=1, keepdims=True))
    if p == 1:
        return jnp.sum(jnp.abs(v), axis=1, keepdims=True)
    a = jnp.abs(v)
    return jnp.power(
        jnp.sum(jnp.power(a, jnp.float32(p)), axis=1, keepdims=True),
        jnp.float32(1.0 / p))


def _pose_loss_kernel(est_ref, gt_ref, sum_x_ref, sum_q_ref, *,
                      p, n_rows, tile_n, steps_per_core):
    c = pl.program_id(0)          # parallel axis (core split on v7x)
    i = pl.program_id(1)          # arbitrary axis (reduction over row tiles)

    # Per-core accumulators are the resident output blocks (their index is
    # constant along the arbitrary axis) -> zero them once per core.
    @pl.when(i == 0)
    def _init():
        sum_x_ref[...] = jnp.zeros_like(sum_x_ref)
        sum_q_ref[...] = jnp.zeros_like(sum_q_ref)

    e = est_ref[...].astype(jnp.float32)              # (tile_n, 7)
    g = gt_ref[...].astype(jnp.float32)

    # Component selector along the 7-wide lane axis.
    lane = lax.broadcasted_iota(jnp.int32, (tile_n, 7), 1)
    is_t = lane < 3                                   # xyz lanes; ~is_t = quat

    # --- translation term: per-pose ||gt_xyz - est_xyz||_p --------------------
    dt = jnp.where(is_t, g - e, 0.0)
    l_x = _pnorm_rows(dt, p)                          # (tile_n, 1)

    # --- rotation term: L2-normalize quaternions (lanes 3:7), residual p-norm -
    # torch F.normalize: q / max(||q||, 1e-12) == q * min(rsqrt(sum q^2), 1e12)
    # (rsqrt on the EUP; clamping the norm keeps torch parity for degenerate /
    # garbage rows and avoids 0*inf NaNs).
    inv_eps = jnp.float32(1e12)
    qg = jnp.where(is_t, 0.0, g)
    qe = jnp.where(is_t, 0.0, e)
    inv_g = jnp.minimum(lax.rsqrt(jnp.sum(qg * qg, axis=1, keepdims=True)), inv_eps)
    inv_e = jnp.minimum(lax.rsqrt(jnp.sum(qe * qe, axis=1, keepdims=True)), inv_eps)
    dq = qg * inv_g - qe * inv_e                      # zeros on xyz lanes
    l_q = _pnorm_rows(dq, p)                          # (tile_n, 1)

    # --- mask rows beyond the true batch --------------------------------------
    # Uses the *logical* (unclamped) tile index, so out-of-range steps of the
    # core split and the partial last tile contribute exactly zero; the where
    # also kills any NaN/Inf computed from padded garbage rows.
    row = lax.broadcasted_iota(jnp.int32, (tile_n, 1), 0)
    start = (c * steps_per_core + i) * tile_n
    valid = (row + start) < n_rows
    l_x = jnp.where(valid, l_x, 0.0)
    l_q = jnp.where(valid, l_q, 0.0)

    sum_x_ref[...] += jnp.sum(l_x, axis=0, keepdims=True).reshape(1, 1, 1)
    sum_q_ref[...] += jnp.sum(l_q, axis=0, keepdims=True).reshape(1, 1, 1)


def camera_pose_loss(est_pose, gt_pose, s_x, s_q, *, learnable, norm,
                     max_tile=4096):
    """est_pose, gt_pose: (N, 7) arrays. s_x, s_q: shape-(1,) float32 params.
    Returns a scalar float32 loss (same semantics as CameraPoseLoss.forward)."""
    n, d = est_pose.shape
    assert d == 7 and gt_pose.shape == (n, d)

    if n <= max_tile:
        tile_n = n                       # single block; "equal full dim" is legal
        nblocks = 1
    else:
        tile_n = max_tile                # multiple of 8; tail masked in-kernel
        nblocks = -(-n // tile_n)

    # Two-way split for v7x's second TensorCore; degenerates to a short serial
    # loop on single-core chips (v5e/v6e).
    c_split = 2 if nblocks >= 2 else 1
    steps = -(-nblocks // c_split)

    def in_map(c, i):
        # Clamp so out-of-range steps of the core split never request an OOB
        # block; the in-kernel row mask (keyed on the unclamped index) makes
        # the duplicated block contribute exactly zero.
        return (jnp.minimum(c * steps + i, nblocks - 1), 0)

    kernel = functools.partial(
        _pose_loss_kernel, p=norm, n_rows=n, tile_n=tile_n,
        steps_per_core=steps)

    out_block = pl.BlockSpec((1, 1, 1), lambda c, i: (c, 0, 0))
    sum_x, sum_q = pl.pallas_call(
        kernel,
        out_shape=(jax.ShapeDtypeStruct((c_split, 1, 1), jnp.float32),
                   jax.ShapeDtypeStruct((c_split, 1, 1), jnp.float32)),
        grid=(c_split, steps),
        in_specs=[pl.BlockSpec((tile_n, 7), in_map),      # est (native layout)
                  pl.BlockSpec((tile_n, 7), in_map)],     # gt  (native layout)
        out_specs=(out_block, out_block),                 # per-core partials
        compiler_params=pltpu.CompilerParams(
            dimension_semantics=("parallel", "arbitrary"),
            vmem_limit_bytes=48 * 1024 * 1024),
    )(est_pose, gt_pose)

    # Batch mean + (learnable or fixed) combination on the per-core partials:
    # a handful of scalar flops, cheapest done in plain JAX.
    inv_n = jnp.float32(1.0 / n)
    l_x = jnp.sum(sum_x) * inv_n
    l_q = jnp.sum(sum_q) * inv_n
    sx = s_x[0].astype(jnp.float32)
    sq = s_q[0].astype(jnp.float32)
    if learnable:
        return l_x * jnp.exp(-sx) + sx + l_q * jnp.exp(-sq) + sq
    return sx * l_x + sq * l_q


def _reference(est, gt, s_x, s_q, *, learnable, norm):
    """Pure-JAX reference mirroring the PyTorch forward."""
    est = est.astype(jnp.float32)
    gt = gt.astype(jnp.float32)
    l_x = jnp.mean(jnp.linalg.norm(gt[:, 0:3] - est[:, 0:3], ord=norm, axis=1))
    qg = gt[:, 3:]
    qe = est[:, 3:]
    qg = qg / jnp.maximum(jnp.linalg.norm(qg, axis=1, keepdims=True), 1e-12)
    qe = qe / jnp.maximum(jnp.linalg.norm(qe, axis=1, keepdims=True), 1e-12)
    l_q = jnp.mean(jnp.linalg.norm(qg - qe, ord=norm, axis=1))
    sx = s_x[0]
    sq = s_q[0]
    if learnable:
        return l_x * jnp.exp(-sx) + sx + l_q * jnp.exp(-sq) + sq
    return sx * l_x + sq * l_q


if __name__ == "__main__":
    # Deterministic synthetic config/params (mimics __init__ of CameraPoseLoss).
    config = {"learnable": True, "s_x": 0.0, "s_q": -3.0, "norm": 2}
    s_x = jnp.array([config["s_x"]], dtype=jnp.float32)
    s_q = jnp.array([config["s_q"]], dtype=jnp.float32)

    key = jax.random.PRNGKey(0)
    k1, k2, k3, k4, k5, k6 = jax.random.split(key, 6)

    # (1) Small batch (single tile), learnable combination.
    est = jax.random.normal(k1, (8, 7), dtype=jnp.float32)
    gt = jax.random.normal(k2, (8, 7), dtype=jnp.float32)
    out = camera_pose_loss(est, gt, s_x, s_q, learnable=True, norm=2)
    jax.block_until_ready(out)
    ref = _reference(est, gt, s_x, s_q, learnable=True, norm=2)
    assert jnp.allclose(out, ref, atol=1e-4, rtol=1e-4), (out, ref)

    # (2) Larger batch, rows not a multiple of 8 (single full-extent block),
    #     fixed-weight combination.
    est = jax.random.normal(k3, (2000, 7), dtype=jnp.float32)
    gt = jax.random.normal(k4, (2000, 7), dtype=jnp.float32)
    out = camera_pose_loss(est, gt, s_x, s_q, learnable=False, norm=2)
    jax.block_until_ready(out)
    ref = _reference(est, gt, s_x, s_q, learnable=False, norm=2)
    assert jnp.allclose(out, ref, atol=1e-4, rtol=1e-4), (out, ref)

    # (3) Multi-block + 2-way core split + partial tile + clamped out-of-range
    #     step, exercised at small shapes by shrinking max_tile:
    #     700 rows / tile 256 -> 3 blocks -> grid (2, 2).  Also covers norm=1.
    est = jax.random.normal(k5, (700, 7), dtype=jnp.float32)
    gt = jax.random.normal(k6, (700, 7), dtype=jnp.float32)
    out = camera_pose_loss(est, gt, s_x, s_q, learnable=True, norm=1,
                           max_tile=256)
    jax.block_until_ready(out)
    ref = _reference(est, gt, s_x, s_q, learnable=True, norm=1)
    assert jnp.allclose(out, ref, atol=1e-4, rtol=1e-4), (out, ref)

    print("KERNEL_OK")
</pallas_src>

<mosaic_0001>
module attributes {stable_mosaic.version = 11 : i64} {
  func.func @_pose_loss_kernel(%arg0: i32, %arg1: i32, %arg2: memref<8x7xf32, #tpu.memory_space<vmem>>, %arg3: memref<8x7xf32, #tpu.memory_space<vmem>>, %arg4: memref<1x1x1xf32, #tpu.memory_space<vmem>>, %arg5: memref<1x1x1xf32, #tpu.memory_space<vmem>>) attributes {dimension_semantics = [#tpu.dimension_semantics<parallel>, #tpu.dimension_semantics<arbitrary>], iteration_bounds = array<i64: 1, 1>, scalar_prefetch = 0 : i64, scratch_operands = 0 : i64, tpu.core_type = #tpu.core_type<tc>, window_params = [{transform_indices = @transform_0, window_bounds = array<i64: 8, 7>}, {transform_indices = @transform_1, window_bounds = array<i64: 8, 7>}, {transform_indices = @transform_2, window_bounds = array<i64: 1, 1, 1>}, {transform_indices = @transform_3, window_bounds = array<i64: 1, 1, 1>}]} {
    %c0_i32 = arith.constant 0 : i32
    %0 = arith.cmpi eq, %arg1, %c0_i32 : i32
    %1 = arith.extui %0 : i1 to i32
    %c0_i32_0 = arith.constant 0 : i32
    %2 = arith.cmpi ne, %1, %c0_i32_0 : i32
    scf.if %2 {
      %cst_29 = arith.constant 0.000000e+00 : f32
      %64 = vector.broadcast %cst_29 : f32 to vector<1x1x1xf32>
      %c0_30 = arith.constant 0 : index
      %c0_31 = arith.constant 0 : index
      %c0_32 = arith.constant 0 : index
      %65 = vector.load %arg4[%c0_30, %c0_31, %c0_32] : memref<1x1x1xf32, #tpu.memory_space<vmem>>, vector<1x1x1xf32>
      tpu.vector_store %arg4[%c0_30, %c0_31, %c0_32], %64 {strides = array<i32>} : memref<1x1x1xf32, #tpu.memory_space<vmem>>, vector<1x1x1xf32>,
      %cst_33 = arith.constant 0.000000e+00 : f32
      %66 = vector.broadcast %cst_33 : f32 to vector<1x1x1xf32>
      %c0_34 = arith.constant 0 : index
      %c0_35 = arith.constant 0 : index
      %c0_36 = arith.constant 0 : index
      %67 = vector.load %arg5[%c0_34, %c0_35, %c0_36] : memref<1x1x1xf32, #tpu.memory_space<vmem>>, vector<1x1x1xf32>
      tpu.vector_store %arg5[%c0_34, %c0_35, %c0_36], %66 {strides = array<i32>} : memref<1x1x1xf32, #tpu.memory_space<vmem>>, vector<1x1x1xf32>,
    } else {
    }
    %c0 = arith.constant 0 : index
    %c0_1 = arith.constant 0 : index
    %3 = vector.load %arg2[%c0, %c0_1] : memref<8x7xf32, #tpu.memory_space<vmem>>, vector<8x7xf32>
    %c0_2 = arith.constant 0 : index
    %c0_3 = arith.constant 0 : index
    %4 = vector.load %arg3[%c0_2, %c0_3] : memref<8x7xf32, #tpu.memory_space<vmem>>, vector<8x7xf32>
    %5 = tpu.iota {dimensions = array<i32: 1>} : vector<8x7xi32>
    %c3_i32 = arith.constant 3 : i32
    %6 = vector.broadcast %c3_i32 : i32 to vector<8x7xi32>
    %7 = arith.cmpi slt, %5, %6 : vector<8x7xi32>
    %8 = arith.subf %4, %3 : vector<8x7xf32>
    %cst = arith.constant 0.000000e+00 : f32
    %9 = vector.broadcast %cst : f32 to vector<8x7xf32>
    %10 = arith.select %7, %8, %9 : vector<8x7xi1>, vector<8x7xf32>
    %11 = arith.mulf %10, %10 : vector<8x7xf32>
    %cst_4 = arith.constant dense<0.000000e+00> : vector<8xf32>
    %12 = vector.multi_reduction <add>, %11, %cst_4 [1] : vector<8x7xf32> to vector<8xf32>
    %13 = vector.shape_cast %12 : vector<8xf32> to vector<8x1xf32>
    %14 = math.sqrt %13 : vector<8x1xf32>
    %cst_5 = arith.constant 0.000000e+00 : f32
    %15 = vector.broadcast %cst_5 : f32 to vector<8x7xf32>
    %16 = arith.select %7, %15, %4 : vector<8x7xi1>, vector<8x7xf32>
    %cst_6 = arith.constant 0.000000e+00 : f32
    %17 = vector.broadcast %cst_6 : f32 to vector<8x7xf32>
    %18 = arith.select %7, %17, %3 : vector<8x7xi1>, vector<8x7xf32>
    %19 = arith.mulf %16, %16 : vector<8x7xf32>
    %cst_7 = arith.constant dense<0.000000e+00> : vector<8xf32>
    %20 = vector.multi_reduction <add>, %19, %cst_7 [1] : vector<8x7xf32> to vector<8xf32>
    %21 = vector.shape_cast %20 : vector<8xf32> to vector<8x1xf32>
    %22 = math.rsqrt %21 : vector<8x1xf32>
    %cst_8 = arith.constant 9.99999995E+11 : f32
    %23 = vector.broadcast %cst_8 : f32 to vector<8x1xf32>
    %24 = arith.minimumf %22, %23 : vector<8x1xf32>
    %25 = arith.mulf %18, %18 : vector<8x7xf32>
    %cst_9 = arith.constant dense<0.000000e+00> : vector<8xf32>
    %26 = vector.multi_reduction <add>, %25, %cst_9 [1] : vector<8x7xf32> to vector<8xf32>
    %27 = vector.shape_cast %26 : vector<8xf32> to vector<8x1xf32>
    %28 = math.rsqrt %27 : vector<8x1xf32>
    %cst_10 = arith.constant 9.99999995E+11 : f32
    %29 = vector.broadcast %cst_10 : f32 to vector<8x1xf32>
    %30 = arith.minimumf %28, %29 : vector<8x1xf32>
    %31 = vector.broadcast %24 : vector<8x1xf32> to vector<8x7xf32>
    %32 = arith.mulf %16, %31 : vector<8x7xf32>
    %33 = vector.broadcast %30 : vector<8x1xf32> to vector<8x7xf32>
    %34 = arith.mulf %18, %33 : vector<8x7xf32>
    %35 = arith.subf %32, %34 : vector<8x7xf32>
    %36 = arith.mulf %35, %35 : vector<8x7xf32>
    %cst_11 = arith.constant dense<0.000000e+00> : vector<8xf32>
    %37 = vector.multi_reduction <add>, %36, %cst_11 [1] : vector<8x7xf32> to vector<8xf32>
    %38 = vector.shape_cast %37 : vector<8xf32> to vector<8x1xf32>
    %39 = math.sqrt %38 : vector<8x1xf32>
    %40 = tpu.iota {dimensions = array<i32: 0>} : vector<8x1xi32>
    %c1_i32 = arith.constant 1 : i32
    %41 = arith.muli %arg0, %c1_i32 : i32
    %42 = arith.addi %41, %arg1 : i32
    %c8_i32 = arith.constant 8 : i32
    %43 = arith.muli %42, %c8_i32 : i32
    %44 = vector.broadcast %43 : i32 to vector<8x1xi32>
    %45 = arith.addi %40, %44 : vector<8x1xi32>
    %c8_i32_12 = arith.constant 8 : i32
    %46 = vector.broadcast %c8_i32_12 : i32 to vector<8x1xi32>
    %47 = arith.cmpi slt, %45, %46 : vector<8x1xi32>
    %cst_13 = arith.constant 0.000000e+00 : f32
    %48 = vector.broadcast %cst_13 : f32 to vector<8x1xf32>
    %49 = arith.select %47, %14, %48 : vector<8x1xi1>, vector<8x1xf32>
    %cst_14 = arith.constant 0.000000e+00 : f32
    %50 = vector.broadcast %cst_14 : f32 to vector<8x1xf32>
    %51 = arith.select %47, %39, %50 : vector<8x1xi1>, vector<8x1xf32>
    %c0_15 = arith.constant 0 : index
    %c0_16 = arith.constant 0 : index
    %c0_17 = arith.constant 0 : index
    %52 = vector.load %arg4[%c0_15, %c0_16, %c0_17] : memref<1x1x1xf32, #tpu.memory_space<vmem>>, vector<1x1x1xf32>
    %cst_18 = arith.constant dense<0.000000e+00> : vector<1xf32>
    %53 = vector.multi_reduction <add>, %49, %cst_18 [0] : vector<8x1xf32> to vector<1xf32>
    %54 = vector.shape_cast %53 : vector<1xf32> to vector<1x1xf32>
    %55 = vector.shape_cast %54 : vector<1x1xf32> to vector<1x1x1xf32>
    %56 = arith.addf %52, %55 : vector<1x1x1xf32>
    %c0_19 = arith.constant 0 : index
    %c0_20 = arith.constant 0 : index
    %c0_21 = arith.constant 0 : index
    %57 = vector.load %arg4[%c0_19, %c0_20, %c0_21] : memref<1x1x1xf32, #tpu.memory_space<vmem>>, vector<1x1x1xf32>
    tpu.vector_store %arg4[%c0_19, %c0_20, %c0_21], %56 {strides = array<i32>} : memref<1x1x1xf32, #tpu.memory_space<vmem>>, vector<1x1x1xf32>,
    %c0_22 = arith.constant 0 : index
    %c0_23 = arith.constant 0 : index
    %c0_24 = arith.constant 0 : index
    %58 = vector.load %arg5[%c0_22, %c0_23, %c0_24] : memref<1x1x1xf32, #tpu.memory_space<vmem>>, vector<1x1x1xf32>
    %cst_25 = arith.constant dense<0.000000e+00> : vector<1xf32>
    %59 = vector.multi_reduction <add>, %51, %cst_25 [0] : vector<8x1xf32> to vector<1xf32>
    %60 = vector.shape_cast %59 : vector<1xf32> to vector<1x1xf32>
    %61 = vector.shape_cast %60 : vector<1x1xf32> to vector<1x1x1xf32>
    %62 = arith.addf %58, %61 : vector<1x1x1xf32>
    %c0_26 = arith.constant 0 : index
    %c0_27 = arith.constant 0 : index
    %c0_28 = arith.constant 0 : index
    %63 = vector.load %arg5[%c0_26, %c0_27, %c0_28] : memref<1x1x1xf32, #tpu.memory_space<vmem>>, vector<1x1x1xf32>
    tpu.vector_store %arg5[%c0_26, %c0_27, %c0_28], %62 {strides = array<i32>} : memref<1x1x1xf32, #tpu.memory_space<vmem>>, vector<1x1x1xf32>,
    return
  }
  func.func @transform_0(%arg0: i32, %arg1: i32) -> (i32, i32) {
    %c1_i32 = arith.constant 1 : i32
    %0 = arith.muli %arg0, %c1_i32 : i32
    %1 = arith.addi %0, %arg1 : i32
    %c0_i32 = arith.constant 0 : i32
    %2 = arith.minsi %1, %c0_i32 : i32
    %c0_i32_0 = arith.constant 0 : i32
    %c0_i32_1 = arith.constant 0 : i32
    return %2, %c0_i32_0 : i32, i32
  }
  func.func @transform_1(%arg0: i32, %arg1: i32) -> (i32, i32) {
    %c1_i32 = arith.constant 1 : i32
    %0 = arith.muli %arg0, %c1_i32 : i32
    %1 = arith.addi %0, %arg1 : i32
    %c0_i32 = arith.constant 0 : i32
    %2 = arith.minsi %1, %c0_i32 : i32
    %c0_i32_0 = arith.constant 0 : i32
    %c0_i32_1 = arith.constant 0 : i32
    return %2, %c0_i32_0 : i32, i32
  }
  func.func @transform_2(%arg0: i32, %arg1: i32) -> (i32, i32, i32) {
    %c0_i32 = arith.constant 0 : i32
    %c0_i32_0 = arith.constant 0 : i32
    %c0_i32_1 = arith.constant 0 : i32
    return %arg0, %c0_i32, %c0_i32_0 : i32, i32, i32
  }
  func.func @transform_3(%arg0: i32, %arg1: i32) -> (i32, i32, i32) {
    %c0_i32 = arith.constant 0 : i32
    %c0_i32_0 = arith.constant 0 : i32
    %c0_i32_1 = arith.constant 0 : i32
    return %arg0, %c0_i32, %c0_i32_0 : i32, i32, i32
  }
}

</mosaic_0001>

<bundles_post_ra>
// kernel: tpu_custom_call.1
= control target key start
LH: loop header
LB: loop body
LE: loop exit
PB: predicated region body
PF: predicated region fallthrough
CT: control target
= control target key end

     0   :  { %9 = vsyncpa [#allocation3], 0  ;;  %s361_s0 = inlined_call_operand.hbm [shape: f32[8,7], index: 0, kind: input, shape index: {}]   ;;  %s362_s1 = inlined_call_operand.hbm [shape: f32[8,7], index: 1, kind: input, shape index: {}]   ;;  %s363_s2 = inlined_call_operand.hbm [shape: f32[1,1,1], index: 2, kind: output, shape index: {0}]   ;;  %s364_s3 = inlined_call_operand.hbm [shape: f32[1,1,1], index: 3, kind: output, shape index: {1}]  }
   0x1   :  { %10 = vsyncpa [#allocation6], 0 }
   0x2   :  { %11 = vsyncpa [#allocation4], 0 }
   0x3   :  { %12 = vsyncpa [#allocation9], 0  ;;  %s280_s12 = smov [#allocation2]   ;;  %s281_s14 = smov [#allocation5]  }
   0x4   :  { %s24_s13 = sshll.u32 %s280_s12, 4  ;;  %s39_s15 = sshll.u32 %s281_s14, 4  ;;  %s25_s13 = int_to_ptr.vmem [resolvable:$true] %s24_s13  ;;  %s40_s15 = int_to_ptr.vmem [resolvable:$true] %s39_s15 }
   0x5   :  { %s184_s18 = scalar_lea.hbm %s361_s0, 128 }
   0x6   :  { %p185_p0 = scmp.ne.s32.totalorder %s361_s0, %s184_s18  ;;  %p188_p1 = scmp.lt.u32.totalorder %s184_s18, %s361_s0 }
   0x8   :  { %p190_p2 = pnand %p188_p1, %p185_p0 }
   0xa   :  { %193 = shalt.err (!%p190_p2)
}
   0xb   :  { %s194_s23 = scalar_lea.vmem %s25_s13, 128  ;;  %p199_p4 = scmp.lt.s32.totalorder %s25_s13, %s25_s13 }
   0xc   :  { %p195_p3 = scmp.ne.s32.totalorder %s25_s13, %s194_s23  ;;  %p200_p5 = scmp.lt.s32.totalorder %s194_s23, %s194_s23 }
   0xe   :  { %p201_p6 = por %p200_p5, %p199_p4 }
  0x10   :  { %p202_p7 = pnand %p201_p6, %p195_p3 }
  0x12   :  { %205 = shalt.err (!%p202_p7)
}
  0x13   :  { %27 = dma.hbm_to_vmem [thread:$0]  %s361_s0, 128, %s25_s13, [#allocation3]  }
  0x14   :  { %s206_s28 = scalar_lea.hbm %s362_s1, 128 }
  0x15   :  { %p207_p8 = scmp.ne.s32.totalorder %s362_s1, %s206_s28  ;;  %p210_p9 = scmp.lt.u32.totalorder %s206_s28, %s362_s1 }
  0x17   :  { %p212_p10 = pnand %p210_p9, %p207_p8 }
  0x19   :  { %215 = shalt.err (!%p212_p10)
}
  0x1a   :  { %s216_s6 = scalar_lea.vmem %s40_s15, 128  ;;  %p221_p12 = scmp.lt.s32.totalorder %s40_s15, %s40_s15 }
  0x1b   :  { %p217_p11 = scmp.ne.s32.totalorder %s40_s15, %s216_s6  ;;  %p222_p13 = scmp.lt.s32.totalorder %s216_s6, %s216_s6 }
  0x1d   :  { %p223_p0 = por %p222_p13, %p221_p12 }
  0x1f   :  { %p224_p1 = pnand %p223_p0, %p217_p11 }
  0x21   :  { %227 = shalt.err (!%p224_p1)
}
  0x22   :  { %42 = dma.hbm_to_vmem [thread:$0]  %s362_s1, 128, %s40_s15, [#allocation6]  }
  0x23   :  { %272 = dma.done.wait [#allocation3], 128  }
  0x24   :  { %273 = vsyncadd [#allocation3], 4294967168 }
  0x25   :  { %274 = dma.done.wait [#allocation6], 128  }
  0x26   :  { %275 = vsyncadd [#allocation6], 4294967168  ;;  %v64_v0 = vlaneseq  ;;  %v63_v2 = vld [vmem:[#allocation5] sm:$0xff]  ;;  %v62_v3 = vld [vmem:[#allocation2] sm:$0xff]  ;;  %vm70_vm1 = vcmask 56320   ;;  %vm59_vm4 = vcmask 0  }
  0x27   :  { %v67_v10 = vsub.f32 %v63_v2, %v62_v3  ;;  %v282_v33 = vmov 0.0   ;;  %s283_s1 = smov [#allocation7]  }
  0x28   :  { %v65_v1 = vand.u32 127, %v64_v0  ;;  %60 = vst.msk [vmem:[#allocation7] sm:$0x1] %vm59_vm4, %v282_v33  ;;  %61 = vst.msk [vmem:[#allocation8] sm:$0x1] %vm59_vm4, %v282_v33  ;;  %s143_s8 = sshll.u32 %s283_s1, 4  ;;  %s144_s8 = int_to_ptr.vmem [resolvable:$true] %s143_s8 }
  0x29   :  { %s228_s9 = scalar_lea.vmem %s144_s8, 16  ;;  %s232_s10 = scalar_lea.vmem %s144_s8, 32 }
  0x2a   :  { %vm66_vm0 = vcmp.lt.s32.totalorder %v65_v1, 3  ;;  %p229_p2 = scmp.ne.s32.totalorder %s144_s8, %s228_s9  ;;  %p233_p3 = scmp.lt.s32.totalorder %s144_s8, %s144_s8 }
  0x2b   :  { %v81_v4 = vsel %vm66_vm0, 0.0, %v63_v2  ;;  %v82_v5 = vsel %vm66_vm0, 0.0, %v62_v3  ;;  %v68_v11 = vsel %vm66_vm0, %v67_v10, 0.0  ;;  %p234_p4 = scmp.lt.s32.totalorder %s232_s10, %s228_s9 }
  0x2c   :  { %v83_v6 = vmul.f32 %v81_v4, %v81_v4  ;;  %v89_v7 = vmul.f32 %v82_v5, %v82_v5  ;;  %v69_v12 = vmul.f32 %v68_v11, %v68_v11 }
  0x2d   :  { %p235_p5 = por %p234_p4, %p233_p3 }
  0x2e   :  { %v84_v8 = vsel %vm70_vm1, %v83_v6, 0.0  ;;  %v90_v9 = vsel %vm70_vm1, %v89_v7, 0.0  ;;  %v71_v13 = vsel %vm70_vm1, %v69_v12, 0.0 }
  0x2f   :  { %85 = vadd.xlane.f32.xlu0 %v84_v8  ;;  %72 = vadd.xlane.f32.xlu1 %v71_v13  ;;  %v118_v38 = vld [vmem:[#allocation7] sm:$0x1]  ;;  %p236_p6 = pnand %p235_p5, %p229_p2 }
  0x33   :  { %91 = vadd.xlane.f32.xlu0 %v90_v9 }
  0xbc   :  { %v86_v14 = vpop.xlane.xlu0 %85  ;;  %v73_v19 = vpop.xlane.xlu1 %72 }
  0xbd   :  { %176 = vrsqrt.f32 %v86_v14  ;;  %vm76_vm2 = vcmp.eq.f32.partialorder %v73_v19, inf  ;;  %v79_v27 = vand.u32 2147483648, %v73_v19  ;;  %vm78_vm3 = vcmp.eq.f32.partialorder %v73_v19, 0.0 }
  0xc0   :  { %v92_v15 = vpop.xlane.xlu0 %91 }
  0xc1   :  { %178 = vrsqrt.f32 %v92_v15 }
  0xc2   :  { %180 = vrsqrt.f32 %v73_v19 }
  0xc7   :  { %v177_v16 = vpop.eup %176 }
  0xc8   :  { %v88_v17 = vmin.f32 %v177_v16, 1e+12 }
  0xca   :  { %v95_v22 = vmul.f32 %v88_v17, %v81_v4 }
  0xcb   :  { %v179_v18 = vpop.eup %178 }
  0xcc   :  { %v94_v20 = vmin.f32 %v179_v18, 1e+12  ;;  %v181_v26 = vpop.eup %180 }
  0xcd   :  { %v75_v28 = vmul.f32 %v181_v26, %v73_v19 }
  0xce   :  { %v96_v21 = vmul.f32 %v94_v20, %v82_v5 }
  0xcf   :  { %v77_v29 = vsel %vm76_vm2, %v73_v19, %v75_v28 }
  0xd0   :  { %v97_v23 = vsub.f32 %v95_v22, %v96_v21  ;;  %v80_v30 = vsel %vm78_vm3, %v79_v27, %v77_v29 }
  0xd1   :  { %v119_v31 = vrot.slane %v80_v30, 4 }
  0xd2   :  { %v98_v24 = vmul.f32 %v97_v23, %v97_v23 }
  0xd3   :  { %v120_v32 = vadd.f32 %v119_v31, %v80_v30 }
  0xd4   :  { %v99_v25 = vsel %vm70_vm1, %v98_v24, 0.0 }
  0xd5   :  { %100 = vadd.xlane.f32.xlu1 %v99_v25  ;;  %v121_v34 = vrot.slane %v120_v32, 2 }
  0xd7   :  { %v122_v35 = vadd.f32 %v121_v34, %v120_v32 }
  0xd9   :  { %v123_v36 = vrot.slane %v122_v35, 1 }
  0xdb   :  { %v124_v37 = vadd.f32 %v123_v36, %v122_v35 }
  0xdd   :  { %v125_v39 = vadd.f32 %v124_v37, %v118_v38 }
  0xdf   :  { %127 = vst.msk [vmem:[#allocation7] sm:$0x1] %vm59_vm4, %v125_v39 }
  0xe0   :  { %239 = shalt.err (!%p236_p6)
}
  0xe1   :  { %s240_s13 = scalar_lea.hbm %s363_s2, 16 }
  0xe2   :  { %p241_p7 = scmp.ne.s32.totalorder %s363_s2, %s240_s13  ;;  %p244_p8 = scmp.lt.u32.totalorder %s240_s13, %s363_s2 }
  0xe4   :  { %p246_p9 = pnand %p244_p8, %p241_p7 }
  0xe6   :  { %249 = shalt.err (!%p246_p9)
}
  0xe7   :  { %146 = dma.vmem_to_hbm [thread:$0]  %s144_s8, 16, %s363_s2, [#allocation4]   ;;  %v128_v51 = vld [vmem:[#allocation8] sm:$0x1] }
  0xe8   :  { %s284_s20 = smov [#allocation8]  }
  0xe9   :  { %s153_s21 = sshll.u32 %s284_s20, 4  ;;  %s154_s21 = int_to_ptr.vmem [resolvable:$true] %s153_s21 }
  0xea   :  { %s250_s2 = scalar_lea.vmem %s154_s21, 16  ;;  %s254_s22 = scalar_lea.vmem %s154_s21, 32 }
  0xeb   :  { %p251_p10 = scmp.ne.s32.totalorder %s154_s21, %s250_s2  ;;  %p255_p11 = scmp.lt.s32.totalorder %s154_s21, %s154_s21 }
  0xec   :  { %p256_p12 = scmp.lt.s32.totalorder %s254_s22, %s250_s2 }
  0xee   :  { %p257_p13 = por %p256_p12, %p255_p11 }
  0xf0   :  { %p258_p0 = pnand %p257_p13, %p251_p10 }
 0x162   :  { %v101_v40 = vpop.xlane.xlu1 %100 }
 0x163   :  { %182 = vrsqrt.f32 %v101_v40  ;;  %vm104_vm5 = vcmp.eq.f32.partialorder %v101_v40, inf  ;;  %v107_v43 = vand.u32 2147483648, %v101_v40  ;;  %vm106_vm6 = vcmp.eq.f32.partialorder %v101_v40, 0.0 }
 0x16d   :  { %v183_v41 = vpop.eup %182 }
 0x16e   :  { %v103_v42 = vmul.f32 %v183_v41, %v101_v40 }
 0x170   :  { %v105_v44 = vsel %vm104_vm5, %v101_v40, %v103_v42 }
 0x171   :  { %v108_v45 = vsel %vm106_vm6, %v107_v43, %v105_v44 }
 0x172   :  { %v129_v46 = vrot.slane %v108_v45, 4 }
 0x174   :  { %v130_v47 = vadd.f32 %v129_v46, %v108_v45 }
 0x176   :  { %v131_v48 = vrot.slane %v130_v47, 2 }
 0x178   :  { %v132_v49 = vadd.f32 %v131_v48, %v130_v47 }
 0x17a   :  { %v133_v50 = vrot.slane %v132_v49, 1 }
 0x17c   :  { %v134_v52 = vadd.f32 %v133_v50, %v132_v49 }
 0x17e   :  { %v135_v53 = vadd.f32 %v134_v52, %v128_v51 }
 0x180   :  { %136 = vst.msk [vmem:[#allocation8] sm:$0x1] %vm59_vm4, %v135_v53 }
 0x181   :  { %261 = shalt.err (!%p258_p0)
}
 0x182   :  { %s262_s25 = scalar_lea.hbm %s364_s3, 16 }
 0x183   :  { %p263_p1 = scmp.ne.s32.totalorder %s364_s3, %s262_s25  ;;  %p266_p2 = scmp.lt.u32.totalorder %s262_s25, %s364_s3 }
 0x185   :  { %p268_p3 = pnand %p266_p2, %p263_p1 }
 0x187   :  { %271 = shalt.err (!%p268_p3)
}
 0x188   :  { %156 = dma.vmem_to_hbm [thread:$0]  %s154_s21, 16, %s364_s3, [#allocation9]  }
 0x189   :  { %276 = dma.done.wait [#allocation4], 16  }
 0x18a   :  { %277 = vsyncadd [#allocation4], 4294967280 }
 0x18b   :  { %278 = dma.done.wait [#allocation9], 16  }
 0x18c   :  { %279 = vsyncadd [#allocation9], 4294967280 }
 0x18d   :  { %163 = vsyncpa [#allocation3], 1 }
 0x18e   :  { %164 = vsyncpa [#allocation6], 1 }
 0x18f   :  { %165 = vsyncpa [#allocation4], 1 }
 0x190   :  { %166 = vsyncpa [#allocation9], 1 }

</bundles_post_ra>
